<compile_context>
chip_gen: v5e
topology: v5e:2x2
jax: 0.10.0
libtpu: 0.0.40
codegen_flags: <defaults>
</compile_context>

<pallas_src>
import jax
import jax.numpy as jnp
from jax.experimental import pallas as pl
from jax.experimental.pallas import tpu as pltpu


def linear_hardswish_kernel(x_ref, w_ref, b_ref, o_ref):
    # x_ref: (N, 1) f32 VMEM   (input column)
    # w_ref: (1, F) f32 VMEM   (weight row)
    # b_ref: (1, F) f32 VMEM   (bias row)
    # o_ref: (N, F) f32 VMEM
    x = x_ref[...]                       # (N, 1)
    w = w_ref[...]                       # (1, F)
    b = b_ref[...]                       # (1, F)

    v1 = x * w + b                       # (N, F) lane/sublane broadcast on the VPU
    gate = jnp.clip(v1 * (1.0 / 6.0) + 0.5, 0.0, 1.0)   # == clamp(v1+3, 0, 6) / 6
    o_ref[...] = v1 * gate               # single full-block store


def linear_hardswish(x, w, b):
    """x: (N, 1) f32, w: (1, F) f32, b: (F,) f32 -> (N, F) f32."""
    N, K = x.shape
    K2, F = w.shape
    assert K == 1 and K2 == 1

    return pl.pallas_call(
        linear_hardswish_kernel,
        out_shape=jax.ShapeDtypeStruct((N, F), x.dtype),
        in_specs=[
            pl.BlockSpec(memory_space=pltpu.MemorySpace.VMEM),   # x column
            pl.BlockSpec(memory_space=pltpu.MemorySpace.VMEM),   # W row
            pl.BlockSpec(memory_space=pltpu.MemorySpace.VMEM),   # b row
        ],
        out_specs=pl.BlockSpec(memory_space=pltpu.MemorySpace.VMEM),
    )(x, w, b.reshape(1, F))


def reference(x, w, b):
    v1 = x @ w + b.reshape(1, -1)
    return v1 * jnp.clip(v1 + 3.0, 0.0, 6.0) / 6.0


if __name__ == "__main__":
    key = jax.random.PRNGKey(0)
    k_x, k_w, k_b = jax.random.split(key, 3)

    N, K, F = 4, 1, 512  # matches torch.randn(4, 1) and Linear(1, 512)

    x = jax.random.normal(k_x, (N, K), dtype=jnp.float32)
    # Deterministic init mimicking torch.nn.Linear: U(-1/sqrt(K), 1/sqrt(K))
    bound = 1.0 / float(K) ** 0.5
    w = jax.random.uniform(k_w, (K, F), dtype=jnp.float32, minval=-bound, maxval=bound)
    b = jax.random.uniform(k_b, (F,), dtype=jnp.float32, minval=-bound, maxval=bound)

    out = jax.block_until_ready(linear_hardswish(x, w, b))
    ref = reference(x, w, b)

    assert out.shape == (N, F), out.shape
    assert jnp.allclose(out, ref, atol=1e-5, rtol=1e-5), "mismatch vs reference"

    print("KERNEL_OK")
</pallas_src>

<mosaic_0001>
module attributes {stable_mosaic.version = 11 : i64} {
  func.func @linear_hardswish_kernel(%arg0: memref<4x1xf32, #tpu.memory_space<vmem>>, %arg1: memref<1x512xf32, #tpu.memory_space<vmem>>, %arg2: memref<1x512xf32, #tpu.memory_space<vmem>>, %arg3: memref<4x512xf32, #tpu.memory_space<vmem>>) attributes {dimension_semantics = [], scalar_prefetch = 0 : i64, scratch_operands = 0 : i64, tpu.core_type = #tpu.core_type<tc>} {
    %c0 = arith.constant 0 : index
    %c0_0 = arith.constant 0 : index
    %0 = vector.load %arg0[%c0, %c0_0] : memref<4x1xf32, #tpu.memory_space<vmem>>, vector<4x1xf32>
    %c0_1 = arith.constant 0 : index
    %c0_2 = arith.constant 0 : index
    %1 = vector.load %arg1[%c0_1, %c0_2] : memref<1x512xf32, #tpu.memory_space<vmem>>, vector<1x512xf32>
    %c0_3 = arith.constant 0 : index
    %c0_4 = arith.constant 0 : index
    %2 = vector.load %arg2[%c0_3, %c0_4] : memref<1x512xf32, #tpu.memory_space<vmem>>, vector<1x512xf32>
    %3 = vector.broadcast %0 : vector<4x1xf32> to vector<4x512xf32>
    %4 = vector.broadcast %1 : vector<1x512xf32> to vector<4x512xf32>
    %5 = arith.mulf %3, %4 : vector<4x512xf32>
    %6 = vector.broadcast %2 : vector<1x512xf32> to vector<4x512xf32>
    %7 = arith.addf %5, %6 : vector<4x512xf32>
    %cst = arith.constant 0.166666672 : f32
    %8 = vector.broadcast %cst : f32 to vector<4x512xf32>
    %9 = arith.mulf %7, %8 : vector<4x512xf32>
    %cst_5 = arith.constant 5.000000e-01 : f32
    %10 = vector.broadcast %cst_5 : f32 to vector<4x512xf32>
    %11 = arith.addf %9, %10 : vector<4x512xf32>
    %cst_6 = arith.constant 0.000000e+00 : f32
    %cst_7 = arith.constant 1.000000e+00 : f32
    %12 = vector.broadcast %cst_6 : f32 to vector<4x512xf32>
    %13 = arith.maximumf %12, %11 : vector<4x512xf32>
    %14 = vector.broadcast %cst_7 : f32 to vector<4x512xf32>
    %15 = arith.minimumf %14, %13 : vector<4x512xf32>
    %16 = arith.mulf %7, %15 : vector<4x512xf32>
    %c0_8 = arith.constant 0 : index
    %c0_9 = arith.constant 0 : index
    %17 = vector.load %arg3[%c0_8, %c0_9] : memref<4x512xf32, #tpu.memory_space<vmem>>, vector<4x512xf32>
    tpu.vector_store %arg3[%c0_8, %c0_9], %16 {strides = array<i32>} : memref<4x512xf32, #tpu.memory_space<vmem>>, vector<4x512xf32>,
    return
  }
}

</mosaic_0001>

<bundles_post_ra>
// kernel: tpu_custom_call.1
= control target key start
LH: loop header
LB: loop body
LE: loop exit
PB: predicated region body
PF: predicated region fallthrough
CT: control target
= control target key end

     0   :  { %8 = vsyncpa [#allocation3], 0  ;;  %s204_s0 = inlined_call_operand.vmem [shape: f32[4,1], index: 0, kind: input, shape index: {}]   ;;  %s205_s1 = inlined_call_operand.vmem [shape: f32[1,512], index: 1, kind: input, shape index: {}]   ;;  %s206_s2 = inlined_call_operand.hbm [shape: f32[1,512], index: 2, kind: input, shape index: {}]   ;;  %s207_s3 = inlined_call_operand.hbm [shape: f32[4,512], index: 3, kind: output, shape index: {}]  }
   0x1   :  { %9 = vsyncpa [#allocation4], 0  ;;  %s19_s14 = sshll.u32 %s206_s2, 4  ;;  %s169_s15 = smov [#allocation2]   ;;  %s20_s14 = int_to_ptr.hbm [resolvable:$true] %s19_s14 }
   0x2   :  { %s21_s16 = sshll.u32 %s169_s15, 4  ;;  %s22_s16 = int_to_ptr.vmem [resolvable:$true] %s21_s16 }
   0x3   :  { %24 = dma.hbm_to_vmem [thread:$0]  %s20_s14, 64, %s22_s16, [#allocation3]  }
   0x4   :  { %165 = dma.done.wait [#allocation3], 64  }
   0x5   :  { %166 = vsyncadd [#allocation3], 4294967232  ;;  %v170_v0 = vmov 0   ;;  %v29_v1 = vld [vmem:[%s204_s0] sm:$0xf]  ;;  %vm89_vm0 = vcmask 1043456  }
   0x6   :  { %116 = vset.pattern.permute.xlu0 %v170_v0  ;;  %v30_v2 = vld [vmem:[%s205_s1] sm:$0xf]  ;;  %s171_s0 = smov [#allocation5]   ;;  %s103_s22 = sshll.u32 %s207_s3, 4  ;;  %s104_s22 = int_to_ptr.hbm [resolvable:$true] %s103_s22 }
   0x7   :  { %34 = vperm.xlu0 %116, %v29_v1   ;;  %v31_v3 = vld [vmem:[#allocation2] sm:$0xf]  ;;  %v38_v4 = vperm.slane %v30_v2, 0  ;;  %v39_v5 = vperm.slane %v30_v2, 1  ;;  %v40_v6 = vperm.slane %v30_v2, 2  ;;  %v41_v7 = vperm.slane %v30_v2, 3 }
   0x8   :  { %v51_v8 = vperm.slane %v31_v3, 0  ;;  %v52_v9 = vperm.slane %v31_v3, 1  ;;  %v53_v10 = vperm.slane %v31_v3, 2  ;;  %v54_v11 = vperm.slane %v31_v3, 3  ;;  %s101_s1 = sshll.u32 %s171_s0, 4  ;;  %s102_s1 = int_to_ptr.vmem [resolvable:$true] %s101_s1 }
  0x79   :  { %v35_v12 = vpop.permute.xlu0 %34 }
  0x7a   :  { %v46_v13 = vmul.f32 %v38_v4, %v35_v12  ;;  %v47_v14 = vmul.f32 %v39_v5, %v35_v12  ;;  %v48_v15 = vmul.f32 %v40_v6, %v35_v12  ;;  %v49_v16 = vmul.f32 %v41_v7, %v35_v12 }
  0x7c   :  { %v59_v17 = vadd.f32 %v51_v8, %v46_v13  ;;  %v60_v18 = vadd.f32 %v52_v9, %v47_v14  ;;  %v61_v19 = vadd.f32 %v53_v10, %v48_v15  ;;  %v62_v20 = vadd.f32 %v54_v11, %v49_v16 }
  0x7e   :  { %v63_v21 = vmul.f32 0.16666667, %v59_v17  ;;  %v64_v22 = vmul.f32 0.16666667, %v60_v18  ;;  %v65_v23 = vmul.f32 0.16666667, %v61_v19 }
  0x7f   :  { %v66_v24 = vmul.f32 0.16666667, %v62_v20 }
  0x80   :  { %v67_v25 = vadd.f32 0.5, %v63_v21  ;;  %v68_v26 = vadd.f32 0.5, %v64_v22  ;;  %v69_v27 = vadd.f32 0.5, %v65_v23 }
  0x81   :  { %v70_v28 = vadd.f32 0.5, %v66_v24 }
  0x82   :  { %v71_v29 = vmax.f32 %v67_v25, 0.0  ;;  %v72_v30 = vmax.f32 %v68_v26, 0.0  ;;  %v73_v31 = vmax.f32 %v69_v27, 0.0 }
  0x83   :  { %v74_v32 = vmax.f32 %v70_v28, 0.0 }
  0x84   :  { %v75_v33 = vmin.f32 %v71_v29, 1.0  ;;  %v76_v34 = vmin.f32 %v72_v30, 1.0  ;;  %v77_v35 = vmin.f32 %v73_v31, 1.0 }
  0x85   :  { %v78_v36 = vmin.f32 %v74_v32, 1.0 }
  0x86   :  { %v80_v37 = vmul.f32 %v76_v34, %v60_v18  ;;  %v79_v39 = vmul.f32 %v75_v33, %v59_v17  ;;  %v81_v41 = vmul.f32 %v77_v35, %v61_v19 }
  0x87   :  { %v82_v38 = vmul.f32 %v78_v36, %v62_v20 }
  0x88   :  { %v87_v40 = vrot.slane %v80_v37, 4 }
  0x89   :  { %v88_v42 = vrot.slane %v82_v38, 4 }
  0x8a   :  { %v90_v43 = vsel %vm89_vm0, %v79_v39, %v87_v40 }
  0x8b   :  { %v91_v44 = vsel %vm89_vm0, %v81_v41, %v88_v42  ;;  %94 = vst [vmem:[#allocation5] sm:$0xff] %v90_v43 }
  0x8c   :  { %95 = vst [vmem:[#allocation5 + $0x8] sm:$0xff] %v91_v44 }
  0x8d   :  { %106 = dma.vmem_to_hbm [thread:$0]  %s102_s1, 256, %s104_s22, [#allocation4]  }
  0x8e   :  { %167 = dma.done.wait [#allocation4], 256  }
  0x8f   :  { %168 = vsyncadd [#allocation4], 4294967040 }
  0x90   :  { %111 = vsyncpa [#allocation3], 1 }
  0x91   :  { %112 = vsyncpa [#allocation4], 1 }

</bundles_post_ra>
